<compile_context>
chip_gen: v7x
topology: tpu7x:2x2x1
jax: 0.10.0
libtpu: 0.0.40
codegen_flags: <defaults>
</compile_context>

<pallas_src>
import functools

import jax
import jax.numpy as jnp
from jax.experimental import pallas as pl
from jax.experimental.pallas import tpu as pltpu


def _round_up(v, m):
    return -(-v // m) * m


def _adaptive_reduce_kernel(a_ref, x_ref, o_ref, m_ref, den_ref, num_ref,
                            *, n_valid, tile_n, ragged):
    """One (row-tile, N-tile) grid step of the online-softmax blend reduction.

    a_ref:   (tr, 1)   per-row blend parameter (row = flattened (b, c))
    x_ref:   (tr, tn)  current spatial tile of the input
    o_ref:   (tr, 1)   output (written on the last N tile only)
    m_ref:   (tr, 1)   running max of a*x             (VMEM scratch, f32)
    den_ref: (tr, 1)   running sum of exp(a*x - m)    (VMEM scratch, f32)
    num_ref: (tr, 1)   running sum of x*exp(a*x - m)  (VMEM scratch, f32)
    """
    k = pl.program_id(1)
    nk = pl.num_programs(1)

    @pl.when(k == 0)
    def _init():
        m_ref[...] = jnp.full_like(m_ref, -jnp.inf)
        den_ref[...] = jnp.zeros_like(den_ref)
        num_ref[...] = jnp.zeros_like(num_ref)

    a = a_ref[...].astype(jnp.float32)            # (tr, 1), broadcasts over lanes

    def accumulate(x, s):
        m_prev = m_ref[...]
        m_new = jnp.maximum(m_prev, jnp.max(s, axis=-1, keepdims=True))
        scale = jnp.exp(m_prev - m_new)           # == 0 on the very first tile
        e = jnp.exp(s - m_new)                    # EUP; masked lanes -> 0
        den_ref[...] = scale * den_ref[...] + jnp.sum(e, axis=-1, keepdims=True)
        num_ref[...] = scale * num_ref[...] + jnp.sum(x * e, axis=-1, keepdims=True)
        m_ref[...] = m_new

    if ragged:
        # Mask only on the partial last tile; full tiles pay no iota/compare.
        @pl.when(k == nk - 1)
        def _partial_tile():
            x = x_ref[...].astype(jnp.float32)
            col = k * tile_n + jax.lax.broadcasted_iota(jnp.int32, x.shape, 1)
            valid = col < n_valid
            # OOB lanes of a partial block are undefined (possibly NaN):
            # zero x itself AND send the logit to -inf so exp() -> 0 exactly.
            x = jnp.where(valid, x, 0.0)
            s = jnp.where(valid, a * x, -jnp.inf)
            accumulate(x, s)

        @pl.when(k != nk - 1)
        def _full_tile():
            x = x_ref[...].astype(jnp.float32)
            accumulate(x, a * x)
    else:
        x = x_ref[...].astype(jnp.float32)
        accumulate(x, a * x)

    @pl.when(k == nk - 1)
    def _finalize():
        # Exact reciprocal on a (tr, 1) slab only; approx=True (~2^-12 rel err)
        # would risk the 1e-5 check and saves nothing off the hot path.
        o_ref[...] = (num_ref[...] *
                      pl.reciprocal(den_ref[...], approx=False)).astype(o_ref.dtype)


def _vmem_budgets():
    """Returns (per-x-buffer budget bytes, vmem_limit_bytes), generation-aware."""
    try:
        vmem = pltpu.get_tpu_info().vmem_capacity_bytes
    except Exception:
        vmem = 64 * 1024 * 1024                   # assume the smallest (v7x)
    if vmem >= 96 * 1024 * 1024:                  # v5e / v6e: 128 MiB physical
        return 16 * 1024 * 1024, 64 * 1024 * 1024
    # v7x: 64 MiB physical -> keep the depth-2 pipeline comfortably inside it.
    return 12 * 1024 * 1024, 40 * 1024 * 1024


def adaptive_reduce(x_nd, a, *, tile_n=None):
    """x_nd: (B, C, *spatial); a: (1, C, 1). Returns (B, C) in x's dtype."""
    B, C = x_nd.shape[0], x_nd.shape[1]
    R = B * C
    # 'b c ... -> b c (...)', then pack (b, c) into one dense row axis.
    x = x_nd.reshape(R, -1)
    N = x.shape[-1]
    out_dtype = x_nd.dtype
    itemsize = jnp.dtype(x_nd.dtype).itemsize

    # Per-row blend parameter: row r = b*C + c  ->  a[0, c, 0].
    a_rows = jnp.broadcast_to(a.reshape(1, C), (B, C)).reshape(R, 1)

    per_buf_budget, vmem_limit = _vmem_budgets()

    # ---- lane (spatial) tile: balanced multiples of 128, no wrapper-side pad.
    if tile_n is None:
        max_tile_n = max(128, (per_buf_budget // (8 * itemsize)) // 128 * 128)
        if max_tile_n >= N:
            tile_n = N                                    # single full-width tile
        else:
            num_n = -(-N // max_tile_n)                   # balance the tiles
            tile_n = _round_up(-(-N // num_n), 128)
    elif tile_n >= N:
        tile_n = N
    else:
        assert tile_n % 128 == 0, "lane tile must be a multiple of 128"
    num_n_tiles = -(-N // tile_n)
    ragged = (N % tile_n) != 0                            # partial last N block

    # ---- row tile: multiple of 8 (dense sublanes), sized to the VMEM budget.
    if R <= 8:
        row_tile = R                                      # full dim: always legal
    else:
        # x double-buffer + lane-padded (row, 1) slabs (3 scratch + out + a).
        per_row_bytes = 2 * itemsize * tile_n + 5 * 512
        max_rows = max(8, ((2 * per_buf_budget) // per_row_bytes // 8) * 8)
        row_tile = min(max_rows, (R // 8) * 8)
        if R >= 16:
            # Keep >=2 steps on the parallel axis so v7x can shard across TCs.
            row_tile = min(row_tile, max(8, ((R // 2) // 8) * 8))
    num_r_tiles = -(-R // row_tile)

    cost = pl.CostEstimate(
        flops=6 * R * N,
        transcendentals=R * N,
        bytes_accessed=(x.size * itemsize
                        + a_rows.size * jnp.dtype(a_rows.dtype).itemsize
                        + R * jnp.dtype(out_dtype).itemsize),
    )

    out = pl.pallas_call(
        functools.partial(_adaptive_reduce_kernel,
                          n_valid=N, tile_n=tile_n, ragged=ragged),
        out_shape=jax.ShapeDtypeStruct((R, 1), out_dtype),
        grid_spec=pltpu.PrefetchScalarGridSpec(
            num_scalar_prefetch=0,
            grid=(num_r_tiles, num_n_tiles),
            in_specs=[
                pl.BlockSpec((row_tile, 1), lambda r, k: (r, 0)),        # a (tiny)
                pl.BlockSpec((row_tile, tile_n), lambda r, k: (r, k)),   # x (streamed)
            ],
            out_specs=pl.BlockSpec((row_tile, 1), lambda r, k: (r, 0)),  # resident over k
            scratch_shapes=[
                pltpu.VMEM((row_tile, 1), jnp.float32),   # running max m
                pltpu.VMEM((row_tile, 1), jnp.float32),   # running sum(exp)
                pltpu.VMEM((row_tile, 1), jnp.float32),   # running sum(x*exp)
            ],
        ),
        compiler_params=pltpu.CompilerParams(
            dimension_semantics=("parallel", "arbitrary"),
            vmem_limit_bytes=vmem_limit,
        ),
        cost_estimate=cost,
    )(a_rows, x)

    return out.reshape(B, C)


def adaptive_reduce_ref(x_nd, a):
    """Pure-JAX reference matching the PyTorch forward exactly."""
    B, C = x_nd.shape[0], x_nd.shape[1]
    x = x_nd.reshape(B, C, -1)
    w = jax.nn.softmax(a * x, axis=-1)
    return jnp.sum(x * w, axis=-1)


if __name__ == "__main__":
    key = jax.random.PRNGKey(0)
    kx, ka, kx2, kx3 = jax.random.split(key, 4)

    # Primary shape from the spec: (B, C, H, W) = (2, 4, 16, 16).
    B, C, H, W = 2, 4, 16, 16
    x = jax.random.normal(kx, (B, C, H, W), dtype=jnp.float32)

    # nn.Parameter(torch.zeros(1, dim, 1)) defaults to zeros (pure mean);
    # use a small deterministic non-zero init so the blend path is exercised.
    a = 0.5 * jax.random.normal(ka, (1, C, 1), dtype=jnp.float32)

    out = adaptive_reduce(x, a)
    jax.block_until_ready(out)
    ref = adaptive_reduce_ref(x, a)
    assert out.shape == (B, C)
    assert jnp.allclose(out, ref, atol=1e-5, rtol=1e-5), (out, ref)

    # Ragged spatial size + forced small lane tile: multi-tile online softmax
    # with a masked partial last block (no wrapper-side padding anymore).
    x2 = jax.random.normal(kx2, (B, C, 20, 20), dtype=jnp.float32)   # N = 400
    out2 = adaptive_reduce(x2, a, tile_n=128)                        # 4 N tiles, last partial
    jax.block_until_ready(out2)
    ref2 = adaptive_reduce_ref(x2, a)
    assert out2.shape == (B, C)
    assert jnp.allclose(out2, ref2, atol=1e-5, rtol=1e-5), (out2, ref2)

    # Awkward row count (B*C = 15, not a multiple of 8): partial row block.
    C3 = 5
    x3 = jax.random.normal(kx3, (3, C3, 9, 7), dtype=jnp.float32)    # N = 63
    a3 = 0.3 * jax.random.normal(ka, (1, C3, 1), dtype=jnp.float32)
    out3 = adaptive_reduce(x3, a3)
    jax.block_until_ready(out3)
    ref3 = adaptive_reduce_ref(x3, a3)
    assert out3.shape == (3, C3)
    assert jnp.allclose(out3, ref3, atol=1e-5, rtol=1e-5), (out3, ref3)

    print("KERNEL_OK")
</pallas_src>

<mosaic_0001>
module attributes {stable_mosaic.version = 11 : i64} {
  func.func @_adaptive_reduce_kernel(%arg0: i32, %arg1: i32, %arg2: memref<8x1xf32, #tpu.memory_space<vmem>>, %arg3: memref<8x256xf32, #tpu.memory_space<vmem>>, %arg4: memref<8x1xf32, #tpu.memory_space<vmem>>, %arg5: memref<8x1xf32, #tpu.memory_space<vmem>>, %arg6: memref<8x1xf32, #tpu.memory_space<vmem>>, %arg7: memref<8x1xf32, #tpu.memory_space<vmem>>) attributes {dimension_semantics = [#tpu.dimension_semantics<parallel>, #tpu.dimension_semantics<arbitrary>], iteration_bounds = array<i64: 1, 1>, scalar_prefetch = 0 : i64, scratch_operands = 3 : i64, tpu.core_type = #tpu.core_type<tc>, window_params = [{transform_indices = @transform_0, window_bounds = array<i64: 8, 1>}, {transform_indices = @transform_1, window_bounds = array<i64: 8, 256>}, {transform_indices = @transform_2, window_bounds = array<i64: 8, 1>}]} {
    %c0_i32 = arith.constant 0 : i32
    %0 = arith.cmpi eq, %arg1, %c0_i32 : i32
    %1 = arith.extui %0 : i1 to i32
    %c0_i32_0 = arith.constant 0 : i32
    %2 = arith.cmpi ne, %1, %c0_i32_0 : i32
    scf.if %2 {
      %cst_20 = arith.constant 0xFF800000 : f32
      %33 = vector.broadcast %cst_20 : f32 to vector<8x1xf32>
      %c0_21 = arith.constant 0 : index
      %c0_22 = arith.constant 0 : index
      %34 = vector.load %arg5[%c0_21, %c0_22] : memref<8x1xf32, #tpu.memory_space<vmem>>, vector<8x1xf32>
      tpu.vector_store %arg5[%c0_21, %c0_22], %33 {strides = array<i32>} : memref<8x1xf32, #tpu.memory_space<vmem>>, vector<8x1xf32>,
      %cst_23 = arith.constant 0.000000e+00 : f32
      %35 = vector.broadcast %cst_23 : f32 to vector<8x1xf32>
      %c0_24 = arith.constant 0 : index
      %c0_25 = arith.constant 0 : index
      %36 = vector.load %arg6[%c0_24, %c0_25] : memref<8x1xf32, #tpu.memory_space<vmem>>, vector<8x1xf32>
      tpu.vector_store %arg6[%c0_24, %c0_25], %35 {strides = array<i32>} : memref<8x1xf32, #tpu.memory_space<vmem>>, vector<8x1xf32>,
      %cst_26 = arith.constant 0.000000e+00 : f32
      %37 = vector.broadcast %cst_26 : f32 to vector<8x1xf32>
      %c0_27 = arith.constant 0 : index
      %c0_28 = arith.constant 0 : index
      %38 = vector.load %arg7[%c0_27, %c0_28] : memref<8x1xf32, #tpu.memory_space<vmem>>, vector<8x1xf32>
      tpu.vector_store %arg7[%c0_27, %c0_28], %37 {strides = array<i32>} : memref<8x1xf32, #tpu.memory_space<vmem>>, vector<8x1xf32>,
    } else {
    }
    %c0 = arith.constant 0 : index
    %c0_1 = arith.constant 0 : index
    %3 = vector.load %arg2[%c0, %c0_1] : memref<8x1xf32, #tpu.memory_space<vmem>>, vector<8x1xf32>
    %c0_2 = arith.constant 0 : index
    %c0_3 = arith.constant 0 : index
    %4 = vector.load %arg3[%c0_2, %c0_3] : memref<8x256xf32, #tpu.memory_space<vmem>>, vector<8x256xf32>
    %5 = vector.broadcast %3 : vector<8x1xf32> to vector<8x256xf32>
    %6 = arith.mulf %5, %4 : vector<8x256xf32>
    %c0_4 = arith.constant 0 : index
    %c0_5 = arith.constant 0 : index
    %7 = vector.load %arg5[%c0_4, %c0_5] : memref<8x1xf32, #tpu.memory_space<vmem>>, vector<8x1xf32>
    %cst = arith.constant dense<0xFF800000> : vector<8xf32>
    %8 = vector.multi_reduction <maximumf>, %6, %cst [1] : vector<8x256xf32> to vector<8xf32>
    %9 = vector.shape_cast %8 : vector<8xf32> to vector<8x1xf32>
    %10 = arith.maximumf %7, %9 : vector<8x1xf32>
    %11 = arith.subf %7, %10 : vector<8x1xf32>
    %12 = math.exp %11 : vector<8x1xf32>
    %13 = vector.broadcast %10 : vector<8x1xf32> to vector<8x256xf32>
    %14 = arith.subf %6, %13 : vector<8x256xf32>
    %15 = math.exp %14 : vector<8x256xf32>
    %c0_6 = arith.constant 0 : index
    %c0_7 = arith.constant 0 : index
    %16 = vector.load %arg6[%c0_6, %c0_7] : memref<8x1xf32, #tpu.memory_space<vmem>>, vector<8x1xf32>
    %17 = arith.mulf %12, %16 : vector<8x1xf32>
    %cst_8 = arith.constant dense<0.000000e+00> : vector<8xf32>
    %18 = vector.multi_reduction <add>, %15, %cst_8 [1] : vector<8x256xf32> to vector<8xf32>
    %19 = vector.shape_cast %18 : vector<8xf32> to vector<8x1xf32>
    %20 = arith.addf %17, %19 : vector<8x1xf32>
    %c0_9 = arith.constant 0 : index
    %c0_10 = arith.constant 0 : index
    %21 = vector.load %arg6[%c0_9, %c0_10] : memref<8x1xf32, #tpu.memory_space<vmem>>, vector<8x1xf32>
    tpu.vector_store %arg6[%c0_9, %c0_10], %20 {strides = array<i32>} : memref<8x1xf32, #tpu.memory_space<vmem>>, vector<8x1xf32>,
    %c0_11 = arith.constant 0 : index
    %c0_12 = arith.constant 0 : index
    %22 = vector.load %arg7[%c0_11, %c0_12] : memref<8x1xf32, #tpu.memory_space<vmem>>, vector<8x1xf32>
    %23 = arith.mulf %12, %22 : vector<8x1xf32>
    %24 = arith.mulf %4, %15 : vector<8x256xf32>
    %cst_13 = arith.constant dense<0.000000e+00> : vector<8xf32>
    %25 = vector.multi_reduction <add>, %24, %cst_13 [1] : vector<8x256xf32> to vector<8xf32>
    %26 = vector.shape_cast %25 : vector<8xf32> to vector<8x1xf32>
    %27 = arith.addf %23, %26 : vector<8x1xf32>
    %c0_14 = arith.constant 0 : index
    %c0_15 = arith.constant 0 : index
    %28 = vector.load %arg7[%c0_14, %c0_15] : memref<8x1xf32, #tpu.memory_space<vmem>>, vector<8x1xf32>
    tpu.vector_store %arg7[%c0_14, %c0_15], %27 {strides = array<i32>} : memref<8x1xf32, #tpu.memory_space<vmem>>, vector<8x1xf32>,
    %c0_16 = arith.constant 0 : index
    %c0_17 = arith.constant 0 : index
    %29 = vector.load %arg5[%c0_16, %c0_17] : memref<8x1xf32, #tpu.memory_space<vmem>>, vector<8x1xf32>
    tpu.vector_store %arg5[%c0_16, %c0_17], %10 {strides = array<i32>} : memref<8x1xf32, #tpu.memory_space<vmem>>, vector<8x1xf32>,
    %c0_i32_18 = arith.constant 0 : i32
    %30 = arith.cmpi eq, %arg1, %c0_i32_18 : i32
    %31 = arith.extui %30 : i1 to i32
    %c0_i32_19 = arith.constant 0 : i32
    %32 = arith.cmpi ne, %31, %c0_i32_19 : i32
    scf.if %32 {
      %c0_20 = arith.constant 0 : index
      %c0_21 = arith.constant 0 : index
      %33 = vector.load %arg7[%c0_20, %c0_21] : memref<8x1xf32, #tpu.memory_space<vmem>>, vector<8x1xf32>
      %c0_22 = arith.constant 0 : index
      %c0_23 = arith.constant 0 : index
      %34 = vector.load %arg6[%c0_22, %c0_23] : memref<8x1xf32, #tpu.memory_space<vmem>>, vector<8x1xf32>
      %35 = tpu.reciprocal %34 : vector<8x1xf32> -> vector<8x1xf32>
      %36 = arith.mulf %33, %35 : vector<8x1xf32>
      %c0_24 = arith.constant 0 : index
      %c0_25 = arith.constant 0 : index
      %37 = vector.load %arg4[%c0_24, %c0_25] : memref<8x1xf32, #tpu.memory_space<vmem>>, vector<8x1xf32>
      tpu.vector_store %arg4[%c0_24, %c0_25], %36 {strides = array<i32>} : memref<8x1xf32, #tpu.memory_space<vmem>>, vector<8x1xf32>,
    } else {
    }
    return
  }
  func.func @transform_0(%arg0: i32, %arg1: i32) -> (i32, i32) {
    %c0_i32 = arith.constant 0 : i32
    %c0_i32_0 = arith.constant 0 : i32
    return %arg0, %c0_i32 : i32, i32
  }
  func.func @transform_1(%arg0: i32, %arg1: i32) -> (i32, i32) {
    %c0_i32 = arith.constant 0 : i32
    return %arg0, %arg1 : i32, i32
  }
  func.func @transform_2(%arg0: i32, %arg1: i32) -> (i32, i32) {
    %c0_i32 = arith.constant 0 : i32
    %c0_i32_0 = arith.constant 0 : i32
    return %arg0, %c0_i32 : i32, i32
  }
}

</mosaic_0001>

<bundles_post_ra>
// kernel: tpu_custom_call.1
= control target key start
LH: loop header
LB: loop body
LE: loop exit
PB: predicated region body
PF: predicated region fallthrough
CT: control target
= control target key end

     0   :  { %7 = vsyncpa [#allocation6], 0  ;;  %s129_s9 = smov [#allocation5]   ;;  %s173_s0 = inlined_call_operand.vmem [shape: f32[8,1], index: 0, kind: input, shape index: {}]   ;;  %s174_s1 = inlined_call_operand.hbm [shape: f32[8,256], index: 1, kind: input, shape index: {}]   ;;  %s175_s2 = inlined_call_operand.vmem [shape: f32[8,1], index: 2, kind: output, shape index: {}]  }
   0x1   :  { %s16_s10 = sshll.u32 %s129_s9, 4  ;;  %s105_s13 = scalar_lea.hbm %s174_s1, 256  ;;  %s17_s10 = int_to_ptr.vmem [resolvable:$true] %s16_s10 }
   0x2   :  { %p106_p0 = scmp.ne.s32.totalorder %s174_s1, %s105_s13  ;;  %p109_p1 = scmp.lt.u32.totalorder %s105_s13, %s174_s1 }
   0x4   :  { %p111_p2 = pnand %p109_p1, %p106_p0 }
   0x6   :  { %114 = shalt.err (!%p111_p2)
}
   0x7   :  { %s115_s18 = scalar_lea.vmem %s17_s10, 256  ;;  %p120_p4 = scmp.lt.s32.totalorder %s17_s10, %s17_s10 }
   0x8   :  { %p116_p3 = scmp.ne.s32.totalorder %s17_s10, %s115_s18  ;;  %p121_p5 = scmp.lt.s32.totalorder %s115_s18, %s115_s18 }
   0xa   :  { %p122_p6 = por %p121_p5, %p120_p4 }
   0xc   :  { %p123_p7 = pnand %p122_p6, %p116_p3 }
   0xe   :  { %126 = shalt.err (!%p123_p7)
}
   0xf   :  { %19 = dma.hbm_to_vmem [thread:$0]  %s174_s1, 256, %s17_s10, [#allocation6]  }
  0x10   :  { %127 = dma.done.wait [#allocation6], 256  }
  0x11   :  { %128 = vsyncadd [#allocation6], 4294967040  ;;  %v130_v0 = vmov 0   ;;  %v31_v1 = vld [vmem:[%s173_s0] sm:$0xff]  ;;  %vm27_vm0 = vcmask 7168   ;;  %v131_v2 = vmov -inf  }
  0x12   :  { %95 = vset.pattern.permute.xlu0 %v130_v0  ;;  %96 = vset.pattern.permute.xlu1 %v130_v0  ;;  %28 = vst.msk [vmem:[#allocation2] sm:$0xff] %vm27_vm0, %v131_v2  ;;  %v32_v3 = vld [vmem:[#allocation5] sm:$0xff]  ;;  %v33_v4 = vld [vmem:[#allocation5 + $0x8] sm:$0xff]  ;;  %v132_v9 = vmov 0.0  }
  0x13   :  { %36 = vperm.xlu0 %95, %v31_v1   ;;  %29 = vst.msk [vmem:[#allocation3] sm:$0xff] %vm27_vm0, %v132_v9  ;;  %30 = vst.msk [vmem:[#allocation4] sm:$0xff] %vm27_vm0, %v132_v9 }
  0x19   :  { %v41_v10 = vld [vmem:[#allocation2] sm:$0xff] }
  0x1a   :  { %v60_v27 = vld [vmem:[#allocation3] sm:$0xff]  ;;  %v68_v28 = vld [vmem:[#allocation4] sm:$0xff] }
  0x92   :  { %v37_v5 = vpop.permute.xlu0 %36 }
  0x93   :  { %v39_v6 = vmul.f32 %v37_v5, %v32_v3  ;;  %v40_v7 = vmul.f32 %v37_v5, %v33_v4 }
  0x95   :  { %v42_v8 = vmax.f32 %v39_v6, %v40_v7 }
  0x97   :  { %43 = vmax.xlane.f32.xlu0 %v42_v8 }
 0x124   :  { %v44_v11 = vpop.xlane.xlu0 %43 }
 0x125   :  { %v45_v12 = vmax.f32 %v41_v10, %v44_v11 }
 0x127   :  { %v46_v13 = vsub.f32 %v41_v10, %v45_v12  ;;  %77 = vst.msk [vmem:[#allocation2] sm:$0xff] %vm27_vm0, %v45_v12  ;;  %51 = vperm.xlu1 %96, %v45_v12  }
 0x129   :  { %v47_v25 = vmul.f32 1.442695, %v46_v13 }
 0x1a6   :  { %v52_v14 = vpop.permute.xlu1 %51 }
 0x1a7   :  { %v54_v15 = vsub.f32 %v39_v6, %v52_v14  ;;  %v55_v16 = vsub.f32 %v40_v7, %v52_v14 }
 0x1a9   :  { %v56_v17 = vmul.f32 1.442695, %v54_v15  ;;  %v58_v18 = vmul.f32 1.442695, %v55_v16 }
 0x1ab   :  { %97 = vpow2.f32 %v56_v17 }
 0x1ac   :  { %99 = vpow2.f32 %v58_v18 }
 0x1ad   :  { %101 = vpow2.f32 %v47_v25 }
 0x1b5   :  { %v98_v19 = vpop.eup %97 }
 0x1b6   :  { %v100_v20 = vpop.eup %99  ;;  %v70_v21 = vmul.f32 %v98_v19, %v32_v3 }
 0x1b7   :  { %v62_v22 = vadd.f32 %v100_v20, %v98_v19  ;;  %v71_v23 = vmul.f32 %v100_v20, %v33_v4  ;;  %v102_v26 = vpop.eup %101 }
 0x1b8   :  { %v61_v29 = vmul.f32 %v102_v26, %v60_v27  ;;  %v69_v32 = vmul.f32 %v102_v26, %v68_v28 }
 0x1b9   :  { %63 = vadd.xlane.f32.xlu1 %v62_v22  ;;  %v72_v24 = vadd.f32 %v71_v23, %v70_v21 }
 0x1bb   :  { %73 = vadd.xlane.f32.xlu0 %v72_v24 }
 0x246   :  { %v64_v30 = vpop.xlane.xlu1 %63 }
 0x247   :  { %v65_v31 = vadd.f32 %v64_v30, %v61_v29 }
 0x248   :  { %v74_v33 = vpop.xlane.xlu0 %73 }
 0x249   :  { %67 = vst.msk [vmem:[#allocation3] sm:$0xff] %vm27_vm0, %v65_v31  ;;  %v75_v34 = vadd.f32 %v74_v33, %v69_v32 }
 0x24b   :  { %76 = vst.msk [vmem:[#allocation4] sm:$0xff] %vm27_vm0, %v75_v34 }
 0x250   :  { %v82_v35 = vld [vmem:[#allocation3] sm:$0xff] }
 0x251   :  { %103 = vrcp.f32 %v82_v35 }
 0x252   :  { %v81_v37 = vld [vmem:[#allocation4] sm:$0xff] }
 0x25b   :  { %v104_v36 = vpop.eup %103 }
 0x25c   :  { %v84_v38 = vmul.f32 %v104_v36, %v81_v37 }
 0x25e   :  { %85 = vst.msk [vmem:[%s175_s2] sm:$0xff] %vm27_vm0, %v84_v38 }
 0x25f   :  { %90 = vsyncpa [#allocation6], 1 }

</bundles_post_ra>
